<compile_context>
chip_gen: v6e
topology: v6e:2x2x1
jax: 0.10.0
libtpu: 0.0.40
codegen_flags: <defaults>
</compile_context>

<pallas_src>
import functools

import jax
import jax.numpy as jnp
from jax.experimental import pallas as pl
from jax.experimental.pallas import tpu as pltpu


OUT_LANES = 128          # lane-dense padded width of the final layer
MAX_TILE_B = 256         # vreg-pressure bound for f32 (TB,128) intermediates


def _round_up(x, m):
    return ((x + m - 1) // m) * m


def make_qnetwork_kernel(tile_b, num_chunks):
    """Builds the kernel body for a fixed batch tile / sub-chain count."""
    chunk = tile_b // num_chunks

    def kernel(x_ref,
               wi_ref, bi_ref,
               w1_ref, b1_ref,
               w2_ref, b2_ref,
               wf_ref, bf_ref,
               out_ref):
        # Weights (bf16) and biases (f32) — single VMEM block, resident.
        wi = wi_ref[...]
        w1 = w1_ref[...]
        w2 = w2_ref[...]
        wf = wf_ref[...]
        bi = bi_ref[...]
        b1 = b1_ref[...]
        b2 = b2_ref[...]
        bfin = bf_ref[...]

        bf16 = jnp.bfloat16

        # Two independent sub-chains traced into one block -> the LLO
        # scheduler interleaves them to keep the MXU fed.
        for c in range(num_chunks):
            lo = c * chunk                      # static offset
            x = x_ref[pl.ds(lo, chunk), :]      # bf16 tile

            # fci: linear, no activation
            h0 = jnp.dot(x, wi, preferred_element_type=jnp.float32) + bi

            # fc1 + relu
            h1 = jnp.dot(h0.astype(bf16), w1,
                         preferred_element_type=jnp.float32) + b1
            h1 = jnp.maximum(h1, 0.0)

            # fc2 + leaky_relu (slope 0.01)  — max(x, 0.01*x)
            h2 = jnp.dot(h1.astype(bf16), w2,
                         preferred_element_type=jnp.float32) + b2
            h2 = jnp.maximum(h2, 0.01 * h2)

            # fcf: final linear (lane-dense, zero-padded columns)
            q = jnp.dot(h2.astype(bf16), wf,
                        preferred_element_type=jnp.float32) + bfin

            out_ref[pl.ds(lo, chunk), :] = q.astype(out_ref.dtype)

    return kernel


@functools.partial(jax.jit, static_argnames=("tile_b",))
def qnetwork_forward(state, params, *, tile_b=MAX_TILE_B):
    """state: (B, state_dim) f32. params: dict name -> (W, b) with PyTorch
    layout W=(out, in), b=(out,). Returns (B, action_dim) f32."""
    B, state_dim = state.shape
    (wi, bi), (w1, b1), (w2, b2), (wf, bfin) = (
        params["fci"], params["fc1"], params["fc2"], params["fcf"])

    hidden_dim = wi.shape[0]
    action_dim = wf.shape[0]

    # --- batch tiling: TB multiple of 16 (bf16 sublane packing), bounded by
    # vreg pressure (f32 (TB,128) intermediates), pad B up to a TB multiple.
    tb = min(tile_b, _round_up(B, 16))
    tb = _round_up(tb, 16)
    b_pad = _round_up(B, tb)

    x = state
    if b_pad != B:
        x = jnp.pad(x, ((0, b_pad - B), (0, 0)))
    x = x.astype(jnp.bfloat16)

    # --- lane-dense final layer: zero-pad out columns to OUT_LANES.
    n_out = _round_up(max(action_dim, OUT_LANES), 128)
    wf_p = jnp.zeros((hidden_dim, n_out), jnp.float32).at[:, :action_dim].set(wf.T)
    bf_p = jnp.zeros((1, n_out), jnp.float32).at[:, :action_dim].set(
        bfin.reshape(1, -1))

    args = (
        x,
        wi.T.astype(jnp.bfloat16), bi.reshape(1, -1).astype(jnp.float32),
        w1.T.astype(jnp.bfloat16), b1.reshape(1, -1).astype(jnp.float32),
        w2.T.astype(jnp.bfloat16), b2.reshape(1, -1).astype(jnp.float32),
        wf_p.astype(jnp.bfloat16), bf_p.astype(jnp.float32),
    )

    num_chunks = 2 if tb % 16 == 0 else 1
    kernel = make_qnetwork_kernel(tb, num_chunks)

    grid = (b_pad // tb,)

    def batch_map(i):
        return (i, 0)

    def resident_map(i):
        return (0, 0)

    # Explicit BlockSpecs (no late-binding lambdas).
    in_specs = [
        pl.BlockSpec((tb, state_dim), batch_map),              # x tile
        pl.BlockSpec((state_dim, hidden_dim), resident_map),   # wi
        pl.BlockSpec((1, hidden_dim), resident_map),           # bi
        pl.BlockSpec((hidden_dim, hidden_dim), resident_map),  # w1
        pl.BlockSpec((1, hidden_dim), resident_map),           # b1
        pl.BlockSpec((hidden_dim, hidden_dim), resident_map),  # w2
        pl.BlockSpec((1, hidden_dim), resident_map),           # b2
        pl.BlockSpec((hidden_dim, n_out), resident_map),       # wf (padded)
        pl.BlockSpec((1, n_out), resident_map),                # bf (padded)
    ]
    out_spec = pl.BlockSpec((tb, n_out), batch_map)

    q_pad = pl.pallas_call(
        kernel,
        out_shape=jax.ShapeDtypeStruct((b_pad, n_out), jnp.float32),
        grid=grid,
        in_specs=in_specs,
        out_specs=out_spec,
        compiler_params=pltpu.CompilerParams(
            dimension_semantics=("parallel",)),
    )(*args)

    return q_pad[:B, :action_dim]


def init_params(key, state_dim, action_dim, hidden_dim):
    """Deterministic init mimicking nn.Linear's uniform(-1/sqrt(in), 1/sqrt(in))."""
    dims = [("fci", state_dim, hidden_dim),
            ("fc1", hidden_dim, hidden_dim),
            ("fc2", hidden_dim, hidden_dim),
            ("fcf", hidden_dim, action_dim)]
    params = {}
    for name, fan_in, fan_out in dims:
        key, kw, kb = jax.random.split(key, 3)
        bound = 1.0 / jnp.sqrt(fan_in)
        W = jax.random.uniform(kw, (fan_out, fan_in), jnp.float32, -bound, bound)
        b = jax.random.uniform(kb, (fan_out,), jnp.float32, -bound, bound)
        params[name] = (W, b)
    return params


def reference_forward_f32(state, params):
    """Pure-f32 PyTorch-semantics reference (sanity check, loose tolerance)."""
    (wi, bi), (w1, b1), (w2, b2), (wf, bfin) = (
        params["fci"], params["fc1"], params["fc2"], params["fcf"])
    h0 = state @ wi.T + bi
    h1 = jnp.maximum(h0 @ w1.T + b1, 0.0)
    z2 = h1 @ w2.T + b2
    h2 = jnp.where(z2 >= 0.0, z2, 0.01 * z2)
    return h2 @ wf.T + bfin


def reference_forward_bf16(state, params):
    """Reference mirroring the kernel's bf16-inputs / f32-accumulate scheme."""
    bf16 = jnp.bfloat16
    (wi, bi), (w1, b1), (w2, b2), (wf, bfin) = (
        params["fci"], params["fc1"], params["fc2"], params["fcf"])
    x = state.astype(bf16)
    h0 = jnp.dot(x, wi.T.astype(bf16), preferred_element_type=jnp.float32) + bi
    h1 = jnp.dot(h0.astype(bf16), w1.T.astype(bf16),
                 preferred_element_type=jnp.float32) + b1
    h1 = jnp.maximum(h1, 0.0)
    h2 = jnp.dot(h1.astype(bf16), w2.T.astype(bf16),
                 preferred_element_type=jnp.float32) + b2
    h2 = jnp.maximum(h2, 0.01 * h2)
    return jnp.dot(h2.astype(bf16), wf.T.astype(bf16),
                   preferred_element_type=jnp.float32) + bfin


if __name__ == "__main__":
    key = jax.random.PRNGKey(0)
    batch, state_dim, action_dim, hidden_dim = 8, 16, 4, 32

    kp, kx = jax.random.split(key)
    params = init_params(kp, state_dim, action_dim, hidden_dim)
    state = jax.random.normal(kx, (batch, state_dim), jnp.float32)

    q = qnetwork_forward(state, params)
    q = jax.block_until_ready(q)
    assert q.shape == (batch, action_dim)

    # Match the mirrored-precision reference tightly.
    q_ref_bf16 = reference_forward_bf16(state, params)
    assert jnp.allclose(q, q_ref_bf16, atol=2e-3, rtol=2e-3), (
        jnp.max(jnp.abs(q - q_ref_bf16)))

    # Sanity check against full-f32 PyTorch semantics (bf16 weight rounding).
    q_ref_f32 = reference_forward_f32(state, params)
    assert jnp.allclose(q, q_ref_f32, atol=5e-2, rtol=5e-2), (
        jnp.max(jnp.abs(q - q_ref_f32)))

    print("KERNEL_OK")
</pallas_src>

<mosaic_0001>
module attributes {stable_mosaic.version = 11 : i64} {
  func.func @kernel(%arg0: i32, %arg1: memref<16x16xbf16, #tpu.memory_space<vmem>>, %arg2: memref<16x32xbf16, #tpu.memory_space<vmem>>, %arg3: memref<1x32xf32, #tpu.memory_space<vmem>>, %arg4: memref<32x32xbf16, #tpu.memory_space<vmem>>, %arg5: memref<1x32xf32, #tpu.memory_space<vmem>>, %arg6: memref<32x32xbf16, #tpu.memory_space<vmem>>, %arg7: memref<1x32xf32, #tpu.memory_space<vmem>>, %arg8: memref<32x128xbf16, #tpu.memory_space<vmem>>, %arg9: memref<1x128xf32, #tpu.memory_space<vmem>>, %arg10: memref<16x128xf32, #tpu.memory_space<vmem>>) attributes {dimension_semantics = [#tpu.dimension_semantics<parallel>], iteration_bounds = array<i64: 1>, scalar_prefetch = 0 : i64, scratch_operands = 0 : i64, tpu.core_type = #tpu.core_type<tc>, window_params = [{transform_indices = @transform_0, window_bounds = array<i64: 16, 16>}, {pipeline_mode = #tpu.pipeline_mode<synchronous>, transform_indices = @transform_1, window_bounds = array<i64: 16, 32>}, {pipeline_mode = #tpu.pipeline_mode<synchronous>, transform_indices = @transform_2, window_bounds = array<i64: 1, 32>}, {pipeline_mode = #tpu.pipeline_mode<synchronous>, transform_indices = @transform_3, window_bounds = array<i64: 32, 32>}, {pipeline_mode = #tpu.pipeline_mode<synchronous>, transform_indices = @transform_4, window_bounds = array<i64: 1, 32>}, {pipeline_mode = #tpu.pipeline_mode<synchronous>, transform_indices = @transform_5, window_bounds = array<i64: 32, 32>}, {pipeline_mode = #tpu.pipeline_mode<synchronous>, transform_indices = @transform_6, window_bounds = array<i64: 1, 32>}, {pipeline_mode = #tpu.pipeline_mode<synchronous>, transform_indices = @transform_7, window_bounds = array<i64: 32, 128>}, {pipeline_mode = #tpu.pipeline_mode<synchronous>, transform_indices = @transform_8, window_bounds = array<i64: 1, 128>}, {transform_indices = @transform_9, window_bounds = array<i64: 16, 128>}]} {
    %c0 = arith.constant 0 : index
    %c0_0 = arith.constant 0 : index
    %0 = vector.load %arg2[%c0, %c0_0] : memref<16x32xbf16, #tpu.memory_space<vmem>>, vector<16x32xbf16>
    %c0_1 = arith.constant 0 : index
    %c0_2 = arith.constant 0 : index
    %1 = vector.load %arg4[%c0_1, %c0_2] : memref<32x32xbf16, #tpu.memory_space<vmem>>, vector<32x32xbf16>
    %c0_3 = arith.constant 0 : index
    %c0_4 = arith.constant 0 : index
    %2 = vector.load %arg6[%c0_3, %c0_4] : memref<32x32xbf16, #tpu.memory_space<vmem>>, vector<32x32xbf16>
    %c0_5 = arith.constant 0 : index
    %c0_6 = arith.constant 0 : index
    %3 = vector.load %arg8[%c0_5, %c0_6] : memref<32x128xbf16, #tpu.memory_space<vmem>>, vector<32x128xbf16>
    %c0_7 = arith.constant 0 : index
    %c0_8 = arith.constant 0 : index
    %4 = vector.load %arg3[%c0_7, %c0_8] : memref<1x32xf32, #tpu.memory_space<vmem>>, vector<1x32xf32>
    %c0_9 = arith.constant 0 : index
    %c0_10 = arith.constant 0 : index
    %5 = vector.load %arg5[%c0_9, %c0_10] : memref<1x32xf32, #tpu.memory_space<vmem>>, vector<1x32xf32>
    %c0_11 = arith.constant 0 : index
    %c0_12 = arith.constant 0 : index
    %6 = vector.load %arg7[%c0_11, %c0_12] : memref<1x32xf32, #tpu.memory_space<vmem>>, vector<1x32xf32>
    %c0_13 = arith.constant 0 : index
    %c0_14 = arith.constant 0 : index
    %7 = vector.load %arg9[%c0_13, %c0_14] : memref<1x128xf32, #tpu.memory_space<vmem>>, vector<1x128xf32>
    %c0_15 = arith.constant 0 : index
    %c0_16 = arith.constant 0 : index
    %8 = vector.load %arg1[%c0_15, %c0_16] : memref<16x16xbf16, #tpu.memory_space<vmem>>, vector<8x16xbf16>
    %cst = arith.constant dense<0.000000e+00> : vector<8x32xf32>
    %9 = tpu.matmul %8, %0, %cst {dimension_numbers = #tpu.dot_dimension_numbers<[1], [0], [0], [1], [0, 0, 1, 1], [], []>} : vector<8x16xbf16>, vector<16x32xbf16>, vector<8x32xf32> -> vector<8x32xf32>
    %10 = vector.broadcast %4 : vector<1x32xf32> to vector<8x32xf32>
    %11 = arith.addf %9, %10 : vector<8x32xf32>
    %12 = arith.truncf %11 : vector<8x32xf32> to vector<8x32xbf16>
    %cst_17 = arith.constant dense<0.000000e+00> : vector<8x32xf32>
    %13 = tpu.matmul %12, %1, %cst_17 {dimension_numbers = #tpu.dot_dimension_numbers<[1], [0], [0], [1], [0, 0, 1, 1], [], []>} : vector<8x32xbf16>, vector<32x32xbf16>, vector<8x32xf32> -> vector<8x32xf32>
    %14 = vector.broadcast %5 : vector<1x32xf32> to vector<8x32xf32>
    %15 = arith.addf %13, %14 : vector<8x32xf32>
    %cst_18 = arith.constant 0.000000e+00 : f32
    %16 = vector.broadcast %cst_18 : f32 to vector<8x32xf32>
    %17 = arith.maximumf %15, %16 : vector<8x32xf32>
    %18 = arith.truncf %17 : vector<8x32xf32> to vector<8x32xbf16>
    %cst_19 = arith.constant dense<0.000000e+00> : vector<8x32xf32>
    %19 = tpu.matmul %18, %2, %cst_19 {dimension_numbers = #tpu.dot_dimension_numbers<[1], [0], [0], [1], [0, 0, 1, 1], [], []>} : vector<8x32xbf16>, vector<32x32xbf16>, vector<8x32xf32> -> vector<8x32xf32>
    %20 = vector.broadcast %6 : vector<1x32xf32> to vector<8x32xf32>
    %21 = arith.addf %19, %20 : vector<8x32xf32>
    %cst_20 = arith.constant 0.00999999977 : f32
    %22 = vector.broadcast %cst_20 : f32 to vector<8x32xf32>
    %23 = arith.mulf %22, %21 : vector<8x32xf32>
    %24 = arith.maximumf %21, %23 : vector<8x32xf32>
    %25 = arith.truncf %24 : vector<8x32xf32> to vector<8x32xbf16>
    %cst_21 = arith.constant dense<0.000000e+00> : vector<8x128xf32>
    %26 = tpu.matmul %25, %3, %cst_21 {dimension_numbers = #tpu.dot_dimension_numbers<[1], [0], [0], [1], [0, 0, 1, 1], [], []>} : vector<8x32xbf16>, vector<32x128xbf16>, vector<8x128xf32> -> vector<8x128xf32>
    %27 = vector.broadcast %7 : vector<1x128xf32> to vector<8x128xf32>
    %28 = arith.addf %26, %27 : vector<8x128xf32>
    %c0_22 = arith.constant 0 : index
    %c0_23 = arith.constant 0 : index
    %29 = vector.load %arg10[%c0_22, %c0_23] : memref<16x128xf32, #tpu.memory_space<vmem>>, vector<8x128xf32>
    tpu.vector_store %arg10[%c0_22, %c0_23], %28 {strides = array<i32>} : memref<16x128xf32, #tpu.memory_space<vmem>>, vector<8x128xf32>,
    %c8 = arith.constant 8 : index
    %c0_24 = arith.constant 0 : index
    %30 = vector.load %arg1[%c8, %c0_24] : memref<16x16xbf16, #tpu.memory_space<vmem>>, vector<8x16xbf16>
    %cst_25 = arith.constant dense<0.000000e+00> : vector<8x32xf32>
    %31 = tpu.matmul %30, %0, %cst_25 {dimension_numbers = #tpu.dot_dimension_numbers<[1], [0], [0], [1], [0, 0, 1, 1], [], []>} : vector<8x16xbf16>, vector<16x32xbf16>, vector<8x32xf32> -> vector<8x32xf32>
    %32 = vector.broadcast %4 : vector<1x32xf32> to vector<8x32xf32>
    %33 = arith.addf %31, %32 : vector<8x32xf32>
    %34 = arith.truncf %33 : vector<8x32xf32> to vector<8x32xbf16>
    %cst_26 = arith.constant dense<0.000000e+00> : vector<8x32xf32>
    %35 = tpu.matmul %34, %1, %cst_26 {dimension_numbers = #tpu.dot_dimension_numbers<[1], [0], [0], [1], [0, 0, 1, 1], [], []>} : vector<8x32xbf16>, vector<32x32xbf16>, vector<8x32xf32> -> vector<8x32xf32>
    %36 = vector.broadcast %5 : vector<1x32xf32> to vector<8x32xf32>
    %37 = arith.addf %35, %36 : vector<8x32xf32>
    %cst_27 = arith.constant 0.000000e+00 : f32
    %38 = vector.broadcast %cst_27 : f32 to vector<8x32xf32>
    %39 = arith.maximumf %37, %38 : vector<8x32xf32>
    %40 = arith.truncf %39 : vector<8x32xf32> to vector<8x32xbf16>
    %cst_28 = arith.constant dense<0.000000e+00> : vector<8x32xf32>
    %41 = tpu.matmul %40, %2, %cst_28 {dimension_numbers = #tpu.dot_dimension_numbers<[1], [0], [0], [1], [0, 0, 1, 1], [], []>} : vector<8x32xbf16>, vector<32x32xbf16>, vector<8x32xf32> -> vector<8x32xf32>
    %42 = vector.broadcast %6 : vector<1x32xf32> to vector<8x32xf32>
    %43 = arith.addf %41, %42 : vector<8x32xf32>
    %cst_29 = arith.constant 0.00999999977 : f32
    %44 = vector.broadcast %cst_29 : f32 to vector<8x32xf32>
    %45 = arith.mulf %44, %43 : vector<8x32xf32>
    %46 = arith.maximumf %43, %45 : vector<8x32xf32>
    %47 = arith.truncf %46 : vector<8x32xf32> to vector<8x32xbf16>
    %cst_30 = arith.constant dense<0.000000e+00> : vector<8x128xf32>
    %48 = tpu.matmul %47, %3, %cst_30 {dimension_numbers = #tpu.dot_dimension_numbers<[1], [0], [0], [1], [0, 0, 1, 1], [], []>} : vector<8x32xbf16>, vector<32x128xbf16>, vector<8x128xf32> -> vector<8x128xf32>
    %49 = vector.broadcast %7 : vector<1x128xf32> to vector<8x128xf32>
    %50 = arith.addf %48, %49 : vector<8x128xf32>
    %c8_31 = arith.constant 8 : index
    %c0_32 = arith.constant 0 : index
    %51 = vector.load %arg10[%c8_31, %c0_32] : memref<16x128xf32, #tpu.memory_space<vmem>>, vector<8x128xf32>
    tpu.vector_store %arg10[%c8_31, %c0_32], %50 {strides = array<i32>} : memref<16x128xf32, #tpu.memory_space<vmem>>, vector<8x128xf32>,
    return
  }
  func.func @transform_0(%arg0: i32) -> (i32, i32) {
    %c0_i32 = arith.constant 0 : i32
    %c0_i32_0 = arith.constant 0 : i32
    return %arg0, %c0_i32 : i32, i32
  }
  func.func @transform_1(%arg0: i32) -> (i32, i32) {
    %c0_i32 = arith.constant 0 : i32
    %c0_i32_0 = arith.constant 0 : i32
    %c0_i32_1 = arith.constant 0 : i32
    return %c0_i32, %c0_i32_0 : i32, i32
  }
  func.func @transform_2(%arg0: i32) -> (i32, i32) {
    %c0_i32 = arith.constant 0 : i32
    %c0_i32_0 = arith.constant 0 : i32
    %c0_i32_1 = arith.constant 0 : i32
    return %c0_i32, %c0_i32_0 : i32, i32
  }
  func.func @transform_3(%arg0: i32) -> (i32, i32) {
    %c0_i32 = arith.constant 0 : i32
    %c0_i32_0 = arith.constant 0 : i32
    %c0_i32_1 = arith.constant 0 : i32
    return %c0_i32, %c0_i32_0 : i32, i32
  }
  func.func @transform_4(%arg0: i32) -> (i32, i32) {
    %c0_i32 = arith.constant 0 : i32
    %c0_i32_0 = arith.constant 0 : i32
    %c0_i32_1 = arith.constant 0 : i32
    return %c0_i32, %c0_i32_0 : i32, i32
  }
  func.func @transform_5(%arg0: i32) -> (i32, i32) {
    %c0_i32 = arith.constant 0 : i32
    %c0_i32_0 = arith.constant 0 : i32
    %c0_i32_1 = arith.constant 0 : i32
    return %c0_i32, %c0_i32_0 : i32, i32
  }
  func.func @transform_6(%arg0: i32) -> (i32, i32) {
    %c0_i32 = arith.constant 0 : i32
    %c0_i32_0 = arith.constant 0 : i32
    %c0_i32_1 = arith.constant 0 : i32
    return %c0_i32, %c0_i32_0 : i32, i32
  }
  func.func @transform_7(%arg0: i32) -> (i32, i32) {
    %c0_i32 = arith.constant 0 : i32
    %c0_i32_0 = arith.constant 0 : i32
    %c0_i32_1 = arith.constant 0 : i32
    return %c0_i32, %c0_i32_0 : i32, i32
  }
  func.func @transform_8(%arg0: i32) -> (i32, i32) {
    %c0_i32 = arith.constant 0 : i32
    %c0_i32_0 = arith.constant 0 : i32
    %c0_i32_1 = arith.constant 0 : i32
    return %c0_i32, %c0_i32_0 : i32, i32
  }
  func.func @transform_9(%arg0: i32) -> (i32, i32) {
    %c0_i32 = arith.constant 0 : i32
    %c0_i32_0 = arith.constant 0 : i32
    return %arg0, %c0_i32 : i32, i32
  }
}

</mosaic_0001>

<bundles_post_ra>
// kernel: qnetwork_forward.1
= control target key start
LH: loop header
LB: loop body
LE: loop exit
PB: predicated region body
PF: predicated region fallthrough
CT: control target
= control target key end

     0   :  { %v593_v0 = vmov 0.0   ;;  %vm594_vm0 = vmmov 0   ;;  %vm64_vm1 = vcmask 130048   ;;  %vm127_vm2 = vcmask 261120   ;;  %s736_s1 = inlined_call_operand.vmem [shape: bf16[16,32], index: 1, kind: input, shape index: {}]   ;;  %s737_s0 = inlined_call_operand.vmem [shape: bf16[16,16], index: 0, kind: input, shape index: {}]   ;;  %s738_s3 = inlined_call_operand.vmem [shape: bf16[32,32], index: 3, kind: input, shape index: {}]   ;;  %s739_s5 = inlined_call_operand.vmem [shape: bf16[32,32], index: 5, kind: input, shape index: {}]   ;;  %s740_s2 = inlined_call_operand.vmem [shape: f32[1,32], index: 2, kind: input, shape index: {}]   ;;  %s741_s4 = inlined_call_operand.vmem [shape: f32[1,32], index: 4, kind: input, shape index: {}]   ;;  %s742_s7 = inlined_call_operand.vmem [shape: bf16[32,128], index: 7, kind: input, shape index: {}]   ;;  %s743_s6 = inlined_call_operand.vmem [shape: f32[1,32], index: 6, kind: input, shape index: {}]   ;;  %s744_s8 = inlined_call_operand.vmem [shape: f32[1,128], index: 8, kind: input, shape index: {}]   ;;  %s745_s9 = inlined_call_operand.vmem [shape: f32[16,128], index: 9, kind: output, shape index: {}]  }
   0x1   :  { %524 = vmatprep.subr.bf16.mxu0 %v593_v0  ;;  %v586_v1 = vld [vmem:[%s736_s1] sm:$0xff]   ;;  %526 = vmatprep.mubr.msk.bf16.mxu0 %vm594_vm0, %v593_v0  ;;  %v660_v3 = vld [vmem:[%s738_s3 + $0x8] sm:$0xff]  }
   0x2   :  { %530 = vmatprep.subr.bf16.mxu1 %v593_v0  ;;  %534 = vmatprep.mubr.msk.bf16.mxu1 %vm594_vm0, %v593_v0  ;;  %v51_v2 = vld [vmem:[%s737_s0] sm:$0xf]  ;;  %v589_v5 = vld [vmem:[%s739_s5 + $0x8] sm:$0xff]   ;;  %v299_v22 = vld [vmem:[%s737_s0 + $0x4] sm:$0xf] }
   0x3   :  { %525 = vmatpush3.bf16.msra.mxu0 %v586_v1  ;;  %531 = vmatpush3.bf16.msra.mxu1 %v660_v3  ;;  %v671_v4 = vld [vmem:[%s738_s3] sm:$0xff]   ;;  %v591_v23 = vld [vmem:[%s742_s7 + $0x8] sm:$0xff]  }
   0x4   :  { %538 = vmatprep.subr.bf16.mxu0 %v593_v0  ;;  %532 = vmatprep.subr.bf16.mxu1 %v593_v0  ;;  %v483_v6 = vld [vmem:[%s740_s2] ss:$0 sm:$0xff] }
   0x5   :  { %v590_v13 = vld [vmem:[%s739_s5] sm:$0xff]  }
   0x6   :  { %527 = vmatmul.mubr.msk.bf16.vlgmr.msra.gmra.mxu0 %vm64_vm1, %v51_v2  ;;  %v486_v14 = vld [vmem:[%s741_s4] ss:$0 sm:$0xff] }
   0x7   :  { %542 = vmatprep.mubr.msk.bf16.mxu0 %vm594_vm0, %v593_v0  ;;  %533 = vmatpush3.bf16.msra.mxu1 %v671_v4  ;;  %v592_v24 = vld [vmem:[%s742_s7] sm:$0xff]  }
   0x8   :  { %546 = vmatprep.subr.bf16.mxu1 %v593_v0  ;;  %539 = vmatpush3.bf16.msra.mxu0 %v589_v5  ;;  %v490_v25 = vld [vmem:[%s743_s6] ss:$0 sm:$0xff] }
   0x9   :  { %540 = vmatprep.subr.bf16.mxu0 %v593_v0  ;;  %v494_v40 = vld [vmem:[%s744_s8] ss:$0 sm:$0xff] }
   0xc   :  { %541 = vmatpush3.bf16.msra.mxu0 %v590_v13 }
   0xd   :  { %554 = vmatprep.subr.bf16.mxu0 %v593_v0 }
  0xc6   :  { %v102_v7 = vpop.f32.mrf.mxu0 }
  0xc7   :  { %v103_v8 = vadd.f32 %v483_v6, %v102_v7 }
  0xc8   :  { %v528_v9 = vpop.f32.mrf.mxu0 }
  0xc9   :  { %v108_v10 = vpack.c.bf16 %v103_v8, %v103_v8 }
  0xca   :  { %v105_v11 = vpop.f32.mrf.mxu0 }
  0xcb   :  { %535 = vmatmul.mubr.msk.bf16.vlgmr.msra.gmra.mxu1 %vm127_vm2, %v108_v10 }
  0xcc   :  { %v529_v12 = vpop.f32.mrf.mxu0  ;;  %550 = vmatprep.mubr.msk.bf16.mxu1 %vm594_vm0, %v593_v0  ;;  %547 = vmatpush3.bf16.msra.mxu1 %v591_v23 }
  0xcd   :  { %548 = vmatprep.subr.bf16.mxu1 %v593_v0 }
  0xd0   :  { %549 = vmatpush3.bf16.msra.mxu1 %v592_v24 }
  0xd1   :  { %560 = vmatprep.subr.bf16.mxu1 %v593_v0 }
 0x18b   :  { %v165_v15 = vpop.f32.mrf.mxu1 }
 0x18c   :  { %v166_v16 = vadd.f32 %v486_v14, %v165_v15 }
 0x18d   :  { %v536_v17 = vpop.f32.mrf.mxu1 }
 0x18e   :  { %v171_v18 = vmax.f32 %v166_v16, 0.0 }
 0x18f   :  { %v168_v19 = vpop.f32.mrf.mxu1 }
 0x190   :  { %v172_v20 = vpack.c.bf16 %v171_v18, %v171_v18 }
 0x191   :  { %v537_v21 = vpop.f32.mrf.mxu1 }
 0x192   :  { %543 = vmatmul.mubr.msk.bf16.vlgmr.msra.gmra.mxu0 %vm127_vm2, %v172_v20 }
 0x193   :  { %555 = vmatpush3.bf16.msra.mxu0 %v586_v1  ;;  %556 = vmatprep.mubr.msk.bf16.mxu0 %vm594_vm0, %v593_v0 }
 0x194   :  { %568 = vmatprep.subr.bf16.mxu0 %v593_v0 }
 0x19a   :  { %557 = vmatmul.mubr.msk.bf16.vlgmr.msra.gmra.mxu0 %vm64_vm1, %v299_v22 }
 0x19b   :  { %569 = vmatpush3.bf16.msra.mxu0 %v589_v5  ;;  %572 = vmatprep.mubr.msk.bf16.mxu0 %vm594_vm0, %v593_v0 }
 0x19c   :  { %570 = vmatprep.subr.bf16.mxu0 %v593_v0 }
 0x19f   :  { %571 = vmatpush3.bf16.msra.mxu0 %v590_v13 }
 0x252   :  { %v228_v26 = vpop.f32.mrf.mxu0 }
 0x253   :  { %v229_v27 = vadd.f32 %v490_v25, %v228_v26 }
 0x254   :  { %v544_v28 = vpop.f32.mrf.mxu0 }
 0x255   :  { %v234_v29 = vmul.f32 0.01, %v229_v27 }
 0x256   :  { %v231_v30 = vpop.f32.mrf.mxu0 }
 0x257   :  { %v235_v31 = vmax.f32 %v229_v27, %v234_v29 }
 0x258   :  { %v545_v32 = vpop.f32.mrf.mxu0 }
 0x259   :  { %v236_v33 = vpack.c.bf16 %v235_v31, %v235_v31 }
 0x25a   :  { %v337_v34 = vpop.f32.mrf.mxu0 }
 0x25b   :  { %v338_v35 = vadd.f32 %v483_v6, %v337_v34  ;;  %551 = vmatmul.mubr.msk.bf16.vlgmr.msra.gmra.mxu1 %vm127_vm2, %v236_v33 }
 0x25c   :  { %561 = vmatpush3.bf16.msra.mxu1 %v660_v3  ;;  %v558_v36 = vpop.f32.mrf.mxu0  ;;  %564 = vmatprep.mubr.msk.bf16.mxu1 %vm594_vm0, %v593_v0 }
 0x25d   :  { %562 = vmatprep.subr.bf16.mxu1 %v593_v0  ;;  %v343_v38 = vpack.c.bf16 %v338_v35, %v338_v35 }
 0x25e   :  { %v340_v37 = vpop.f32.mrf.mxu0 }
 0x260   :  { %563 = vmatpush3.bf16.msra.mxu1 %v671_v4  ;;  %v559_v39 = vpop.f32.mrf.mxu0 }
 0x261   :  { %576 = vmatprep.subr.bf16.mxu1 %v593_v0 }
 0x263   :  { %565 = vmatmul.mubr.msk.bf16.vlgmr.msra.gmra.mxu1 %vm127_vm2, %v343_v38 }
 0x264   :  { %577 = vmatpush3.bf16.msra.mxu1 %v591_v23  ;;  %580 = vmatprep.mubr.msk.bf16.mxu1 %vm594_vm0, %v593_v0 }
 0x265   :  { %578 = vmatprep.subr.bf16.mxu1 %v593_v0 }
 0x268   :  { %579 = vmatpush3.bf16.msra.mxu1 %v592_v24 }
 0x31b   :  { %v292_v41 = vpop.f32.mrf.mxu1 }
 0x31c   :  { %v293_v42 = vadd.f32 %v494_v40, %v292_v41 }
 0x31d   :  { %v552_v43 = vpop.f32.mrf.mxu1 }
 0x31e   :  { %298 = vst [vmem:[%s745_s9] sm:$0xff] %v293_v42 }
 0x31f   :  { %v295_v44 = vpop.f32.mrf.mxu1 }
 0x321   :  { %v553_v45 = vpop.f32.mrf.mxu1 }
 0x323   :  { %v381_v46 = vpop.f32.mrf.mxu1 }
 0x324   :  { %v382_v47 = vadd.f32 %v486_v14, %v381_v46 }
 0x325   :  { %v566_v48 = vpop.f32.mrf.mxu1 }
 0x326   :  { %v387_v49 = vmax.f32 %v382_v47, 0.0 }
 0x327   :  { %v384_v50 = vpop.f32.mrf.mxu1 }
 0x328   :  { %v388_v51 = vpack.c.bf16 %v387_v49, %v387_v49 }
 0x329   :  { %v567_v52 = vpop.f32.mrf.mxu1 }
 0x32a   :  { %573 = vmatmul.mubr.msk.bf16.vlgmr.msra.gmra.mxu0 %vm127_vm2, %v388_v51 }
 0x3ea   :  { %v426_v53 = vpop.f32.mrf.mxu0 }
 0x3eb   :  { %v427_v54 = vadd.f32 %v490_v25, %v426_v53 }
 0x3ec   :  { %v574_v55 = vpop.f32.mrf.mxu0 }
 0x3ed   :  { %v432_v56 = vmul.f32 0.01, %v427_v54 }
 0x3ee   :  { %v429_v57 = vpop.f32.mrf.mxu0 }
 0x3ef   :  { %v433_v58 = vmax.f32 %v427_v54, %v432_v56 }
 0x3f0   :  { %v575_v59 = vpop.f32.mrf.mxu0 }
 0x3f1   :  { %v434_v60 = vpack.c.bf16 %v433_v58, %v433_v58 }
 0x3f3   :  { %581 = vmatmul.mubr.msk.bf16.vlgmr.msra.gmra.mxu1 %vm127_vm2, %v434_v60 }
 0x4b3   :  { %v472_v61 = vpop.f32.mrf.mxu1 }
 0x4b4   :  { %v473_v62 = vadd.f32 %v494_v40, %v472_v61 }
 0x4b5   :  { %v582_v63 = vpop.f32.mrf.mxu1 }
 0x4b6   :  { %478 = vst [vmem:[%s745_s9 + $0x8] sm:$0xff] %v473_v62 }
 0x4b7   :  { %v475_v0 = vpop.f32.mrf.mxu1 }
 0x4b9   :  { %v583_v1 = vpop.f32.mrf.mxu1 }

</bundles_post_ra>
